<compile_context>
chip_gen: v6e
topology: v6e:2x2x1
jax: 0.10.0
libtpu: 0.0.40
codegen_flags: <defaults>
</compile_context>

<pallas_src>
import functools

import jax
import jax.numpy as jnp
import numpy as np
from jax import lax
from jax.experimental import pallas as pl
from jax.experimental.pallas import tpu as pltpu  # noqa: F401  (TPU extensions)

# ---- small, module-consistent sizes -----------------------------------------
VOCAB = 64        # vocab_size
EMBED = 32        # embed_dim
MAXPOS = 16       # max_position
BATCH = 2
SEQ = 8
EPS = 1e-12
LANES = 128       # TPU lane width; output/operand slabs are padded to this


def embeddings_kernel(tok_ids_ref,   # VMEM [N, 1]       int32  (N = B*S)
                      tok_tab_ref,   # VMEM [VOCAB, L]   f32    (lane-padded table)
                      pos_rows_ref,  # VMEM [N, L]       f32    (pre-gathered pos rows)
                      gamma_ref,     # VMEM [1, L]       f32
                      beta_ref,      # VMEM [1, L]       f32
                      out_ref,       # VMEM [N, L]       f32
                      *, embed_dim):
    n = tok_ids_ref.shape[0]
    vocab = tok_tab_ref.shape[0]

    # Token gather as a one-hot MXU matmul (vectorized; fine for toy vocab).
    tok_oh = (lax.broadcasted_iota(jnp.int32, (n, vocab), 1)
              == tok_ids_ref[...]).astype(jnp.float32)
    tok = jnp.dot(tok_oh, tok_tab_ref[...], preferred_element_type=jnp.float32)

    # Positions were gathered in the wrapper; just add.
    x = tok + pos_rows_ref[...]          # padding lanes are exactly 0 + 0 = 0

    # LayerNorm over the real embed_dim lanes (biased variance, eps=1e-12).
    # Padding lanes contribute 0 to the sums; mask them out of the variance.
    inv_e = 1.0 / float(embed_dim)
    mean = jnp.sum(x, axis=-1, keepdims=True) * inv_e
    lane = lax.broadcasted_iota(jnp.int32, x.shape, 1)
    diff = jnp.where(lane < embed_dim, x - mean, 0.0)
    var = jnp.sum(diff * diff, axis=-1, keepdims=True) * inv_e
    y = diff * lax.rsqrt(var + EPS)
    y = y * gamma_ref[...] + beta_ref[...]   # padding lanes stay 0 (gamma/beta pad = 0)

    out_ref[...] = y.astype(out_ref.dtype)   # unmasked 128-lane stores


def _pad_lanes(x, lanes):
    pad = lanes - x.shape[-1]
    if pad <= 0:
        return x
    cfg = [(0, 0)] * (x.ndim - 1) + [(0, pad)]
    return jnp.pad(x, cfg)


def embeddings_forward(input_ids, tok_table, pos_table, gamma, beta):
    B, S = input_ids.shape
    E = tok_table.shape[1]
    N = B * S
    lanes = pl.cdiv(E, LANES) * LANES        # 128 here; multiple of 128 in general

    tok_ids = input_ids.reshape(N, 1).astype(jnp.int32)

    # Positions are static arange(S) tiled over batch -> gather in the wrapper.
    pos_rows = jnp.tile(pos_table[:S], (B, 1))            # [N, E]

    # Lane-pad everything feeding / leaving the kernel to a 128-wide slab.
    tok_tab_p = _pad_lanes(tok_table, lanes)               # [VOCAB, L]
    pos_rows_p = _pad_lanes(pos_rows, lanes)               # [N, L]
    gamma_p = _pad_lanes(gamma.reshape(1, E), lanes)        # [1, L]
    beta_p = _pad_lanes(beta.reshape(1, E), lanes)          # [1, L]

    kernel = functools.partial(embeddings_kernel, embed_dim=E)

    # Single invocation (no grid): every operand is a whole-array VMEM block,
    # the [N, L] result lives in vregs and writes back with one DMA.
    out_flat = pl.pallas_call(
        kernel,
        out_shape=jax.ShapeDtypeStruct((N, lanes), jnp.float32),
    )(tok_ids, tok_tab_p, pos_rows_p, gamma_p, beta_p)

    return out_flat[:, :E].reshape(B, S, E)


def embeddings_reference(input_ids, tok_table, pos_table, gamma, beta):
    S = input_ids.shape[-1]
    tok = tok_table[input_ids]                       # [B, S, E]
    pos = pos_table[jnp.arange(S)][None, :, :]       # [1, S, E]
    x = tok + pos
    mean = jnp.mean(x, axis=-1, keepdims=True)
    var = jnp.mean((x - mean) ** 2, axis=-1, keepdims=True)
    y = (x - mean) / jnp.sqrt(var + EPS)
    return y * gamma + beta


if __name__ == "__main__":
    key = jax.random.PRNGKey(0)
    k_tok, k_pos, k_ids = jax.random.split(key, 3)

    # Deterministic parameter init (mirrors nn.Embedding ~N(0,1),
    # nn.LayerNorm gamma=1, beta=0).
    tok_table = jax.random.normal(k_tok, (VOCAB, EMBED), dtype=jnp.float32)
    pos_table = jax.random.normal(k_pos, (MAXPOS, EMBED), dtype=jnp.float32)
    gamma = jnp.ones((EMBED,), dtype=jnp.float32)
    beta = jnp.zeros((EMBED,), dtype=jnp.float32)

    input_ids = jax.random.randint(k_ids, (BATCH, SEQ), 0, VOCAB, dtype=jnp.int32)

    out = embeddings_forward(input_ids, tok_table, pos_table, gamma, beta)
    out = jax.block_until_ready(out)

    ref = embeddings_reference(input_ids, tok_table, pos_table, gamma, beta)
    assert out.shape == (BATCH, SEQ, EMBED)
    assert np.allclose(np.asarray(out), np.asarray(ref), atol=1e-5, rtol=1e-5)

    print("KERNEL_OK")
</pallas_src>

<mosaic_0001>
module attributes {stable_mosaic.version = 11 : i64} {
  func.func @embeddings_kernel(%arg0: memref<16x1xi32, #tpu.memory_space<vmem>>, %arg1: memref<64x128xf32, #tpu.memory_space<vmem>>, %arg2: memref<16x128xf32, #tpu.memory_space<vmem>>, %arg3: memref<1x128xf32, #tpu.memory_space<vmem>>, %arg4: memref<1x128xf32, #tpu.memory_space<vmem>>, %arg5: memref<16x128xf32, #tpu.memory_space<vmem>>) attributes {dimension_semantics = [], scalar_prefetch = 0 : i64, scratch_operands = 0 : i64, tpu.core_type = #tpu.core_type<tc>} {
    %0 = tpu.iota {dimensions = array<i32: 1>} : vector<16x64xi32>
    %c0 = arith.constant 0 : index
    %c0_0 = arith.constant 0 : index
    %1 = vector.load %arg0[%c0, %c0_0] : memref<16x1xi32, #tpu.memory_space<vmem>>, vector<16x1xi32>
    %2 = vector.broadcast %1 : vector<16x1xi32> to vector<16x64xi32>
    %3 = arith.cmpi eq, %0, %2 : vector<16x64xi32>
    %4 = arith.extui %3 : vector<16x64xi1> to vector<16x64xi32>
    %5 = arith.sitofp %4 : vector<16x64xi32> to vector<16x64xf32>
    %c0_1 = arith.constant 0 : index
    %c0_2 = arith.constant 0 : index
    %6 = vector.load %arg1[%c0_1, %c0_2] : memref<64x128xf32, #tpu.memory_space<vmem>>, vector<64x128xf32>
    %cst = arith.constant dense<0.000000e+00> : vector<16x128xf32>
    %7 = tpu.matmul %5, %6, %cst {dimension_numbers = #tpu.dot_dimension_numbers<[1], [0], [0], [1], [0, 0, 1, 1], [], []>} : vector<16x64xf32>, vector<64x128xf32>, vector<16x128xf32> -> vector<16x128xf32>
    %c0_3 = arith.constant 0 : index
    %c0_4 = arith.constant 0 : index
    %8 = vector.load %arg2[%c0_3, %c0_4] : memref<16x128xf32, #tpu.memory_space<vmem>>, vector<16x128xf32>
    %9 = arith.addf %7, %8 : vector<16x128xf32>
    %cst_5 = arith.constant dense<0.000000e+00> : vector<16xf32>
    %10 = vector.multi_reduction <add>, %9, %cst_5 [1] : vector<16x128xf32> to vector<16xf32>
    %11 = vector.shape_cast %10 : vector<16xf32> to vector<16x1xf32>
    %cst_6 = arith.constant 3.125000e-02 : f32
    %12 = vector.broadcast %cst_6 : f32 to vector<16x1xf32>
    %13 = arith.mulf %11, %12 : vector<16x1xf32>
    %14 = tpu.iota {dimensions = array<i32: 1>} : vector<16x128xi32>
    %c32_i32 = arith.constant 32 : i32
    %15 = vector.broadcast %c32_i32 : i32 to vector<16x128xi32>
    %16 = arith.cmpi slt, %14, %15 : vector<16x128xi32>
    %17 = vector.broadcast %13 : vector<16x1xf32> to vector<16x128xf32>
    %18 = arith.subf %9, %17 : vector<16x128xf32>
    %cst_7 = arith.constant 0.000000e+00 : f32
    %19 = vector.broadcast %cst_7 : f32 to vector<16x128xf32>
    %20 = arith.select %16, %18, %19 : vector<16x128xi1>, vector<16x128xf32>
    %21 = arith.mulf %20, %20 : vector<16x128xf32>
    %cst_8 = arith.constant dense<0.000000e+00> : vector<16xf32>
    %22 = vector.multi_reduction <add>, %21, %cst_8 [1] : vector<16x128xf32> to vector<16xf32>
    %23 = vector.shape_cast %22 : vector<16xf32> to vector<16x1xf32>
    %cst_9 = arith.constant 3.125000e-02 : f32
    %24 = vector.broadcast %cst_9 : f32 to vector<16x1xf32>
    %25 = arith.mulf %23, %24 : vector<16x1xf32>
    %cst_10 = arith.constant 9.99999996E-13 : f32
    %26 = vector.broadcast %cst_10 : f32 to vector<16x1xf32>
    %27 = arith.addf %25, %26 : vector<16x1xf32>
    %28 = math.rsqrt %27 : vector<16x1xf32>
    %29 = vector.broadcast %28 : vector<16x1xf32> to vector<16x128xf32>
    %30 = arith.mulf %20, %29 : vector<16x128xf32>
    %c0_11 = arith.constant 0 : index
    %c0_12 = arith.constant 0 : index
    %31 = vector.load %arg3[%c0_11, %c0_12] : memref<1x128xf32, #tpu.memory_space<vmem>>, vector<1x128xf32>
    %32 = vector.broadcast %31 : vector<1x128xf32> to vector<16x128xf32>
    %33 = arith.mulf %30, %32 : vector<16x128xf32>
    %c0_13 = arith.constant 0 : index
    %c0_14 = arith.constant 0 : index
    %34 = vector.load %arg4[%c0_13, %c0_14] : memref<1x128xf32, #tpu.memory_space<vmem>>, vector<1x128xf32>
    %35 = vector.broadcast %34 : vector<1x128xf32> to vector<16x128xf32>
    %36 = arith.addf %33, %35 : vector<16x128xf32>
    %c0_15 = arith.constant 0 : index
    %c0_16 = arith.constant 0 : index
    %37 = vector.load %arg5[%c0_15, %c0_16] : memref<16x128xf32, #tpu.memory_space<vmem>>, vector<16x128xf32>
    tpu.vector_store %arg5[%c0_15, %c0_16], %36 {strides = array<i32>} : memref<16x128xf32, #tpu.memory_space<vmem>>, vector<16x128xf32>,
    return
  }
}

</mosaic_0001>

<bundles_post_ra>
// kernel: tpu_custom_call.1
= control target key start
LH: loop header
LB: loop body
LE: loop exit
PB: predicated region body
PF: predicated region fallthrough
CT: control target
= control target key end

     0   :  { %10 = vsyncpa [#allocation3], 0  ;;  %s361_s0 = inlined_call_operand.vmem [shape: s32[16,1], index: 0, kind: input, shape index: {}]   ;;  %s362_s1 = inlined_call_operand.hbm [shape: f32[64,128], index: 1, kind: input, shape index: {}]   ;;  %s363_s2 = inlined_call_operand.vmem [shape: f32[16,128], index: 2, kind: input, shape index: {}]   ;;  %s364_s3 = inlined_call_operand.vmem [shape: f32[1,128], index: 3, kind: input, shape index: {}]   ;;  %s365_s4 = inlined_call_operand.vmem [shape: f32[1,128], index: 4, kind: input, shape index: {}]   ;;  %s366_s5 = inlined_call_operand.hbm [shape: f32[16,128], index: 5, kind: output, shape index: {}]  }
   0x1   :  { %11 = vsyncpa [#allocation4], 0  ;;  %s295_s18 = smov [#allocation2]  }
   0x2   :  { %s19_s19 = sshll.u32 %s295_s18, 4  ;;  %s20_s19 = int_to_ptr.vmem [resolvable:$true] %s19_s19 }
   0x3   :  { %s259_s20 = scalar_lea.vmem %s20_s19, 1024  ;;  %p264_p1 = scmp.lt.s32.totalorder %s20_s19, %s20_s19 }
   0x4   :  { %p260_p0 = scmp.ne.s32.totalorder %s20_s19, %s259_s20  ;;  %p265_p2 = scmp.lt.s32.totalorder %s259_s20, %s259_s20 }
   0x6   :  { %p266_p3 = por %p265_p2, %p264_p1 }
   0x8   :  { %p267_p4 = pnand %p266_p3, %p260_p0 }
   0xa   :  { %270 = shalt.err (!%p267_p4)
}
   0xb   :  { %s296_s21 = smov 128   ;;  %s297_s22 = smov 8  }
   0xc   :  { %25 = dma.hbm_to_vmem [thread:$0]  %s362_s1, 1024, %s20_s19, [#allocation3], %s296_s21, %s296_s21, %s297_s22  }
   0xd   :  { %291 = dma.done.wait [#allocation3], 1024  }
   0xe   :  { %292 = vsyncadd [#allocation3], 4294966272  ;;  %v298_v0 = vmov 0   ;;  %v37_v1 = vld [vmem:[%s361_s0] sm:$0xff]  ;;  %v58_v2 = vld [vmem:[#allocation2 + $0x38] sm:$0xff]  ;;  %v35_v11 = vlaneseq  ;;  %vm61_vm0 = vcmask 523264  }
   0xf   :  { %246 = vset.pattern.permute.xlu0 %v298_v0  ;;  %221 = vmatprep.subr.mxu0 %v58_v2  ;;  %v57_v3 = vld [vmem:[#allocation2 + $0x30] sm:$0xff]  ;;  %v38_v4 = vld [vmem:[%s361_s0 + $0x8] sm:$0xff]  ;;  %v55_v6 = vld [vmem:[#allocation2 + $0x20] sm:$0xff]  ;;  %v299_v14 = vmov 0.0   ;;  %s300_s9 = smov [#allocation5]  }
  0x10   :  { %40 = vperm.xlu0 %246, %v37_v1   ;;  %222 = vmatpush3.msra.mxu0 %v58_v2  ;;  %v56_v5 = vld [vmem:[#allocation2 + $0x28] sm:$0xff]  ;;  %v54_v7 = vld [vmem:[#allocation2 + $0x18] sm:$0xff]  ;;  %v53_v8 = vld [vmem:[#allocation2 + $0x10] sm:$0xff]  ;;  %v36_v12 = vand.u32 127, %v35_v11  ;;  %s193_s10 = sshll.u32 %s300_s9, 4  ;;  %s194_s10 = int_to_ptr.vmem [resolvable:$true] %s193_s10 }
  0x11   :  { %223 = vmatprep.subr.mxu0 %v57_v3  ;;  %v52_v9 = vld [vmem:[#allocation2 + $0x8] sm:$0xff]  ;;  %v51_v10 = vld [vmem:[#allocation2] sm:$0xff]  ;;  %s271_s11 = scalar_lea.vmem %s194_s10, 256  ;;  %p276_p6 = scmp.lt.s32.totalorder %s194_s10, %s194_s10 }
  0x12   :  { %224 = vmatpush3.msra.mxu0 %v57_v3  ;;  %v59_v19 = vld [vmem:[%s363_s2] sm:$0xff]  ;;  %v60_v22 = vld [vmem:[%s363_s2 + $0x8] sm:$0xff]  ;;  %vm149_vm3 = vcmp.lt.s32.totalorder %v36_v12, 32  ;;  %p272_p5 = scmp.ne.s32.totalorder %s194_s10, %s271_s11  ;;  %p277_p7 = scmp.lt.s32.totalorder %s271_s11, %s271_s11 }
  0x13   :  { %225 = vmatprep.subr.mxu0 %v56_v5  ;;  %v209_v41 = vld [vmem:[%s364_s3] ss:$0 sm:$0xff] }
  0x14   :  { %43 = vperm.xlu0 %246, %v38_v4   ;;  %226 = vmatpush3.msra.mxu0 %v56_v5  ;;  %v210_v43 = vld [vmem:[%s365_s4] ss:$0 sm:$0xff]  ;;  %p278_p8 = por %p277_p7, %p276_p6 }
  0x15   :  { %227 = vmatprep.subr.mxu0 %v55_v6 }
  0x16   :  { %228 = vmatpush3.msra.mxu0 %v55_v6  ;;  %p279_p9 = pnand %p278_p8, %p272_p5 }
  0x17   :  { %229 = vmatprep.subr.mxu0 %v54_v7 }
  0x18   :  { %230 = vmatpush3.msra.mxu0 %v54_v7 }
  0x19   :  { %231 = vmatprep.subr.mxu0 %v53_v8 }
  0x1a   :  { %232 = vmatpush3.msra.mxu0 %v53_v8 }
  0x1b   :  { %233 = vmatprep.subr.mxu0 %v52_v9 }
  0x1c   :  { %234 = vmatpush3.msra.mxu0 %v52_v9 }
  0x1d   :  { %235 = vmatprep.subr.mxu0 %v51_v10 }
  0x1e   :  { %236 = vmatpush3.msra.mxu0 %v51_v10 }
  0x8b   :  { %v41_v13 = vpop.permute.xlu0 %40 }
  0x8c   :  { %vm45_vm1 = vcmp.eq.s32.totalorder %v36_v12, %v41_v13 }
  0x8d   :  { %v205_v15 = vsel %vm45_vm1, 1.0, %v299_v14 }
  0x8e   :  { %237 = vmatprep.mubr.msk.f32.mxu0 %vm61_vm0, %v205_v15 }
  0x8f   :  { %v44_v16 = vpop.permute.xlu0 %43 }
  0x90   :  { %vm46_vm2 = vcmp.eq.s32.totalorder %v36_v12, %v44_v16 }
  0x91   :  { %v206_v17 = vsel %vm46_vm2, 1.0, %v299_v14 }
  0x92   :  { %238 = vmatmul.mubr.msk.f32.vlgmr.msra.gmra.mxu0 %vm61_vm0, %v206_v17 }
 0x152   :  { %v239_v18 = vpop.f32.mrf.mxu0 }
 0x153   :  { %v140_v23 = vadd.f32 %v239_v18, %v60_v22 }
 0x154   :  { %v134_v20 = vpop.f32.mrf.mxu0 }
 0x155   :  { %v135_v21 = vadd.f32 %v134_v20, %v59_v19 }
 0x157   :  { %143 = vadd.xlane.f32.xlu1 %v135_v21 }
 0x15b   :  { %145 = vadd.xlane.f32.xlu1 %v140_v23 }
 0x1e0   :  { %v144_v24 = vpop.xlane.xlu1 %143 }
 0x1e1   :  { %v147_v25 = vmul.f32 0.03125, %v144_v24 }
 0x1e3   :  { %v150_v26 = vsub.f32 %v135_v21, %v147_v25 }
 0x1e4   :  { %v146_v27 = vpop.xlane.xlu1 %145 }
 0x1e5   :  { %v148_v28 = vmul.f32 0.03125, %v146_v27  ;;  %v152_v29 = vsel %vm149_vm3, %v150_v26, 0.0 }
 0x1e6   :  { %v154_v30 = vmul.f32 %v152_v29, %v152_v29 }
 0x1e7   :  { %v151_v31 = vsub.f32 %v140_v23, %v148_v28 }
 0x1e8   :  { %156 = vadd.xlane.f32.xlu0 %v154_v30 }
 0x1e9   :  { %v153_v32 = vsel %vm149_vm3, %v151_v31, 0.0 }
 0x1ea   :  { %v155_v33 = vmul.f32 %v153_v32, %v153_v32 }
 0x1ec   :  { %158 = vadd.xlane.f32.xlu1 %v155_v33 }
 0x271   :  { %v157_v34 = vpop.xlane.xlu0 %156 }
 0x272   :  { %v160_v35 = vmul.f32 0.03125, %v157_v34 }
 0x274   :  { %v162_v36 = vadd.f32 1e-12, %v160_v35 }
 0x275   :  { %v159_v37 = vpop.xlane.xlu1 %158 }
 0x276   :  { %247 = vrsqrt.f32 %v162_v36  ;;  %v161_v38 = vmul.f32 0.03125, %v159_v37 }
 0x278   :  { %v163_v39 = vadd.f32 1e-12, %v161_v38 }
 0x27a   :  { %249 = vrsqrt.f32 %v163_v39 }
 0x283   :  { %v248_v40 = vpop.eup %247 }
 0x284   :  { %v166_v42 = vmul.f32 %v248_v40, %v152_v29 }
 0x286   :  { %v175_v44 = vmul.f32 %v209_v41, %v166_v42 }
 0x287   :  { %v250_v45 = vpop.eup %249 }
 0x288   :  { %v167_v46 = vmul.f32 %v250_v45, %v153_v32  ;;  %v184_v47 = vadd.f32 %v210_v43, %v175_v44 }
 0x28a   :  { %v176_v48 = vmul.f32 %v209_v41, %v167_v46  ;;  %186 = vst [vmem:[#allocation5] sm:$0xff] %v184_v47 }
 0x28c   :  { %v185_v49 = vadd.f32 %v210_v43, %v176_v48 }
 0x28e   :  { %187 = vst [vmem:[#allocation5 + $0x8] sm:$0xff] %v185_v49 }
 0x28f   :  { %282 = shalt.err (!%p279_p9)
}
 0x290   :  { %199 = dma.vmem_to_hbm [thread:$0]  %s194_s10, 256, %s366_s5, [#allocation4], %s296_s21, %s296_s21, %s297_s22  }
 0x291   :  { %293 = dma.done.wait [#allocation4], 256  }
 0x292   :  { %294 = vsyncadd [#allocation4], 4294967040 }
 0x293   :  { %203 = vsyncpa [#allocation3], 1 }
 0x294   :  { %204 = vsyncpa [#allocation4], 1 }

</bundles_post_ra>
